<compile_context>
chip_gen: v7x
topology: tpu7x:2x2x1
jax: 0.10.0
libtpu: 0.0.40
codegen_flags: <defaults>
</compile_context>

<pallas_src>
from functools import partial
from typing import Tuple

import jax
import jax.numpy as jnp
from jax.experimental import pallas as pl
from jax.experimental.pallas import tpu as pltpu


# ------------------------------- helpers ------------------------------------

def _round_up(x: int, m: int) -> int:
    return (x + m - 1) // m * m


def _cdiv(a: int, b: int) -> int:
    return -(-a // b)


def _working_set_bytes(tm: int, k: int, d_pad: int) -> int:
    """Double-buffered x/out tiles + (default double-buffered) w/params."""
    x_tile = tm * k * 2            # bf16 input tile
    o_tile = tm * d_pad * 2        # bf16 output tile
    resident = k * d_pad * 2 + 8 * d_pad * 4   # bf16 weight + f32 params
    return 2 * (x_tile + o_tile) + 2 * resident


def _choose_tiling(rows: int, k: int, d_pad: int, tm_max: int,
                   vmem_budget: int, min_grid: int = 2):
    """Pick row tile TM so padding waste is < 1 tile, grid >= 2 when possible,
    and the working set fits the (v7x-safe) VMEM budget."""
    rows8 = _round_up(max(rows, 8), 8)
    n_tiles = max(min_grid, _cdiv(rows8, tm_max))
    n_tiles = max(1, min(n_tiles, rows8 // 8))
    tm = _round_up(_cdiv(rows8, n_tiles), 8)
    # Shrink TM (never inflate the limit) if the working set exceeds budget.
    while tm > 8 and _working_set_bytes(tm, k, d_pad) > vmem_budget:
        tm = _round_up(tm // 2, 8)
    rows_pad = _round_up(rows8, tm)
    return tm, rows_pad, rows_pad // tm


# ----------------------------- Pallas kernel --------------------------------

def _patch_embed_ln_kernel(x_ref, w_ref, p_ref, o_ref, *, d_real: int, eps: float):
    """Row-tiled fused patch embedding + LayerNorm.

    x_ref : (TM, K)      bf16  -- flattened image patches (unpadded K)
    w_ref : (K, D_pad)   bf16  -- projection weight, zero-padded along D only
    p_ref : (8, D_pad)   f32   -- row 0: bias, row 1: gamma, row 2: beta
    o_ref : (TM, D_pad)  bf16  -- output patch features (lane-dense)
    """
    # MXU: bf16 x bf16 -> f32 accumulate.
    h = jnp.dot(x_ref[...], w_ref[...], preferred_element_type=jnp.float32)

    params = p_ref[...]                       # (8, D_pad) f32
    h = h + params[0:1, :]                    # bias; padded lanes stay exactly 0

    inv_d = jnp.float32(1.0 / d_real)
    # Padded lanes of h are exactly zero, so unmasked lane sums over D_pad
    # equal the sums over the real embed dim -> no lane mask needed.
    mu = jnp.sum(h, axis=-1, keepdims=True) * inv_d
    ex2 = jnp.sum(h * h, axis=-1, keepdims=True) * inv_d
    var = jnp.maximum(ex2 - mu * mu, 0.0)     # E[x^2] - mu^2 (exact w.r.t. padding)
    inv = jax.lax.rsqrt(var + eps)
    # Padded lanes: (0 - mu) * inv * gamma_pad(=0) + beta_pad(=0) = 0.
    y = (h - mu) * inv * params[1:2, :] + params[2:3, :]
    o_ref[...] = y.astype(o_ref.dtype)        # f32 math, bf16 store


def patch_embed_ln_forward(patches, w_pad, params, *, embed_dim: int,
                           eps: float = 1e-5, tm_max: int = 2048,
                           vmem_budget: int = 48 * 1024 * 1024):
    """patches: [B, P, patch_dim] -> features: [B, P, embed_dim] (bf16).

    w_pad  : (patch_dim, D_pad) bf16   weight zero-padded along D only
    params : (8, D_pad)         f32    rows 0..2 = bias, gamma, beta
    """
    B, P, K = patches.shape
    Kw, D_pad = w_pad.shape
    assert Kw == K, (Kw, K)

    rows = B * P
    TM, rows_pad, grid = _choose_tiling(rows, K, D_pad, tm_max, vmem_budget)

    # Flatten + bf16 cast (fuses with the patchify transpose under jit); pad
    # rows only when the tiling actually requires it.  K is NOT padded.
    x = patches.reshape(rows, K).astype(jnp.bfloat16)
    if rows_pad != rows:
        x = jnp.pad(x, ((0, rows_pad - rows), (0, 0)))

    # Explicit VMEM budget from the actual tile bytes (+ margin); TM was
    # already shrunk so this stays well inside v7x's 64 MiB physical VMEM.
    vmem_limit = int(max(_working_set_bytes(TM, K, D_pad) + (2 << 20), 16 << 20))

    # TODO(synk): on v7x, grid-invariant w/params could use
    # pipeline_mode=pl.Buffered(1) to drop their second buffer (~K*D_pad*2 B).
    out = pl.pallas_call(
        partial(_patch_embed_ln_kernel, d_real=embed_dim, eps=eps),
        out_shape=jax.ShapeDtypeStruct((rows_pad, D_pad), jnp.bfloat16),
        grid_spec=pltpu.PrefetchScalarGridSpec(
            num_scalar_prefetch=0,
            grid=(grid,),
            in_specs=[
                pl.BlockSpec((TM, K), lambda i: (i, 0)),        # row tile of x
                pl.BlockSpec((K, D_pad), lambda i: (0, 0)),     # grid-invariant w
                pl.BlockSpec((8, D_pad), lambda i: (0, 0)),     # grid-invariant params
            ],
            out_specs=pl.BlockSpec((TM, D_pad), lambda i: (i, 0)),
        ),
        compiler_params=pltpu.CompilerParams(
            dimension_semantics=("parallel",),
            vmem_limit_bytes=vmem_limit),
    )(x, w_pad, params)

    # Slice only the dims that were actually padded (no-op copy otherwise).
    if rows_pad != rows:
        out = out[:rows]
    if D_pad != embed_dim:
        out = out[:, :embed_dim]
    return out.reshape(B, P, embed_dim)


# --------------------------- VisionBackbone wrapper --------------------------

class PallasVisionBackbone:
    """Concrete, synthetic VisionBackbone (ViT patch featurizer) on TPU Pallas."""

    def __init__(self,
                 vision_backbone_id: str = "synthetic-vit-pallas",
                 image_resize_strategy: str = "resize-naive",
                 default_image_size: int = 16,
                 patch_size: int = 8,
                 in_channels: int = 3,
                 embed_dim: int = 32,
                 seed: int = 0) -> None:
        self.identifier = vision_backbone_id
        self.image_resize_strategy = image_resize_strategy
        self.default_image_size = default_image_size
        self.patch_size = patch_size
        self.in_channels = in_channels
        self._embed_dim = embed_dim
        self._grid = default_image_size // patch_size
        self._num_patches = self._grid * self._grid
        self.eps = 1e-5                                  # matches nn.LayerNorm default
        patch_dim = in_channels * patch_size * patch_size
        self.patch_dim = patch_dim

        # Deterministic parameter init (synthetic weights, no checkpoint load).
        k = jax.random.PRNGKey(seed)
        kw, kb = jax.random.split(k)
        scale = 1.0 / jnp.sqrt(jnp.float32(patch_dim))
        self.w = jax.random.normal(kw, (patch_dim, embed_dim), jnp.float32) * scale
        self.b = jax.random.normal(kb, (1, embed_dim), jnp.float32) * 0.01
        self.gamma = jnp.ones((1, embed_dim), jnp.float32)
        self.beta = jnp.zeros((1, embed_dim), jnp.float32)

        # Pre-pad / pre-pack kernel-side parameters: pad D only (lane-dense
        # stores); K stays at its natural size (no padded HBM bytes).
        self._d_pad = _round_up(embed_dim, 128)
        w_pad = jnp.zeros((patch_dim, self._d_pad), jnp.float32)
        w_pad = w_pad.at[:, :embed_dim].set(self.w)
        self.w_pad = w_pad.astype(jnp.bfloat16)
        params = jnp.zeros((8, self._d_pad), jnp.float32)
        params = params.at[0, :embed_dim].set(self.b[0])
        params = params.at[1, :embed_dim].set(self.gamma[0])
        params = params.at[2, :embed_dim].set(self.beta[0])
        self.params = params

        # Jit the forward so patchify transpose + bf16 cast + row pad fuse into
        # a single pre-kernel pass instead of separate HBM round trips.
        self._forward_jit = jax.jit(self._forward_impl)

    # -- ImageTransform plumbing (no-op here) --
    def get_image_transform(self):
        return lambda img, **kw: img  # TODO(synk): real PIL ImageTransform (resize/normalize) has no Pallas equivalent

    def get_fsdp_wrapping_policy(self):
        return None  # TODO(synk): FSDP wrapping policy is a torch.distributed concept, N/A in JAX

    # -- properties mirroring the ABC --
    @property
    def default_image_resolution(self) -> Tuple[int, int, int]:
        return (self.in_channels, self.default_image_size, self.default_image_size)

    @property
    def embed_dim(self) -> int:
        return self._embed_dim

    @property
    def num_patches(self) -> int:
        return self._num_patches

    @property
    def half_precision_dtype(self):
        return jnp.bfloat16

    # -- forward --
    def _patchify(self, pixel_values):
        # NCHW -> [B, num_patches, C*ps*ps]
        # TODO(synk): at very large ViT scale this gather could move into the
        # kernel's input DMA (Element index_map over NCHW) to skip the HBM copy.
        B, C, H, W = pixel_values.shape
        ps = self.patch_size
        gh, gw = H // ps, W // ps
        x = pixel_values.reshape(B, C, gh, ps, gw, ps)
        x = jnp.transpose(x, (0, 2, 4, 1, 3, 5))          # [B, gh, gw, C, ps, ps]
        return x.reshape(B, gh * gw, C * ps * ps)

    def _forward_impl(self, pixel_values):
        patches = self._patchify(pixel_values.astype(jnp.float32))
        return patch_embed_ln_forward(patches, self.w_pad, self.params,
                                      embed_dim=self._embed_dim, eps=self.eps)

    def forward(self, pixel_values):
        """pixel_values: [B, C, H, W] -> patch features [B, num_patches, embed_dim] (bf16)."""
        return self._forward_jit(pixel_values)

    __call__ = forward


# ----------------------------------- main ------------------------------------

def _reference_forward(backbone, pixel_values):
    """Pure-JAX reference (same bf16 input/weight rounding, f32 LN math)."""
    patches = backbone._patchify(pixel_values.astype(jnp.float32))
    x = patches.astype(jnp.bfloat16).astype(jnp.float32)
    w = backbone.w.astype(jnp.bfloat16).astype(jnp.float32)
    h = jnp.einsum("bpd,de->bpe", x, w) + backbone.b
    mu = jnp.mean(h, axis=-1, keepdims=True)
    var = jnp.mean((h - mu) ** 2, axis=-1, keepdims=True)
    return (h - mu) * jax.lax.rsqrt(var + backbone.eps) * backbone.gamma + backbone.beta


if __name__ == "__main__":
    key = jax.random.PRNGKey(0)
    B, C, H, W = 2, 3, 16, 16                     # small NCHW images
    pixel_values = jax.random.normal(key, (B, C, H, W), jnp.float32)

    backbone = PallasVisionBackbone(default_image_size=H, patch_size=8,
                                    in_channels=C, embed_dim=32)

    feats = backbone(pixel_values)
    feats = jax.block_until_ready(feats)

    assert feats.shape == (B, backbone.num_patches, backbone.embed_dim), feats.shape
    assert feats.dtype == backbone.half_precision_dtype, feats.dtype

    ref = _reference_forward(backbone, pixel_values)
    # Output is bf16 (kernel math in f32); allow bf16-level rounding error.
    assert jnp.allclose(feats.astype(jnp.float32), ref, atol=2e-2, rtol=2e-2), \
        "mismatch vs reference"

    print("KERNEL_OK")
</pallas_src>

<mosaic_0001>
module attributes {stable_mosaic.version = 11 : i64} {
  func.func @_patch_embed_ln_kernel(%arg0: i32, %arg1: memref<8x192xbf16, #tpu.memory_space<vmem>>, %arg2: memref<192x128xbf16, #tpu.memory_space<vmem>>, %arg3: memref<8x128xf32, #tpu.memory_space<vmem>>, %arg4: memref<8x128xbf16, #tpu.memory_space<vmem>>) attributes {dimension_semantics = [#tpu.dimension_semantics<parallel>], iteration_bounds = array<i64: 1>, scalar_prefetch = 0 : i64, scratch_operands = 0 : i64, tpu.core_type = #tpu.core_type<tc>, window_params = [{transform_indices = @transform_0, window_bounds = array<i64: 8, 192>}, {pipeline_mode = #tpu.pipeline_mode<synchronous>, transform_indices = @transform_1, window_bounds = array<i64: 192, 128>}, {pipeline_mode = #tpu.pipeline_mode<synchronous>, transform_indices = @transform_2, window_bounds = array<i64: 8, 128>}, {transform_indices = @transform_3, window_bounds = array<i64: 8, 128>}]} {
    %c0 = arith.constant 0 : index
    %c0_0 = arith.constant 0 : index
    %0 = vector.load %arg1[%c0, %c0_0] : memref<8x192xbf16, #tpu.memory_space<vmem>>, vector<8x192xbf16>
    %c0_1 = arith.constant 0 : index
    %c0_2 = arith.constant 0 : index
    %1 = vector.load %arg2[%c0_1, %c0_2] : memref<192x128xbf16, #tpu.memory_space<vmem>>, vector<192x128xbf16>
    %cst = arith.constant dense<0.000000e+00> : vector<8x128xf32>
    %2 = tpu.matmul %0, %1, %cst {dimension_numbers = #tpu.dot_dimension_numbers<[1], [0], [0], [1], [0, 0, 1, 1], [], []>} : vector<8x192xbf16>, vector<192x128xbf16>, vector<8x128xf32> -> vector<8x128xf32>
    %c0_3 = arith.constant 0 : index
    %c0_4 = arith.constant 0 : index
    %3 = vector.load %arg3[%c0_3, %c0_4] : memref<8x128xf32, #tpu.memory_space<vmem>>, vector<8x128xf32>
    %4 = vector.extract_strided_slice %3 {offsets = [0, 0], sizes = [1, 128], strides = [1, 1]} : vector<8x128xf32> to vector<1x128xf32>
    %5 = vector.broadcast %4 : vector<1x128xf32> to vector<8x128xf32>
    %6 = arith.addf %2, %5 : vector<8x128xf32>
    %cst_5 = arith.constant dense<0.000000e+00> : vector<8xf32>
    %7 = vector.multi_reduction <add>, %6, %cst_5 [1] : vector<8x128xf32> to vector<8xf32>
    %8 = vector.shape_cast %7 : vector<8xf32> to vector<8x1xf32>
    %cst_6 = arith.constant 3.125000e-02 : f32
    %9 = vector.broadcast %cst_6 : f32 to vector<8x1xf32>
    %10 = arith.mulf %8, %9 : vector<8x1xf32>
    %11 = arith.mulf %6, %6 : vector<8x128xf32>
    %cst_7 = arith.constant dense<0.000000e+00> : vector<8xf32>
    %12 = vector.multi_reduction <add>, %11, %cst_7 [1] : vector<8x128xf32> to vector<8xf32>
    %13 = vector.shape_cast %12 : vector<8xf32> to vector<8x1xf32>
    %cst_8 = arith.constant 3.125000e-02 : f32
    %14 = vector.broadcast %cst_8 : f32 to vector<8x1xf32>
    %15 = arith.mulf %13, %14 : vector<8x1xf32>
    %16 = arith.mulf %10, %10 : vector<8x1xf32>
    %17 = arith.subf %15, %16 : vector<8x1xf32>
    %cst_9 = arith.constant 0.000000e+00 : f32
    %18 = vector.broadcast %cst_9 : f32 to vector<8x1xf32>
    %19 = arith.maximumf %17, %18 : vector<8x1xf32>
    %cst_10 = arith.constant 9.99999974E-6 : f32
    %20 = vector.broadcast %cst_10 : f32 to vector<8x1xf32>
    %21 = arith.addf %19, %20 : vector<8x1xf32>
    %22 = math.rsqrt %21 : vector<8x1xf32>
    %23 = vector.broadcast %10 : vector<8x1xf32> to vector<8x128xf32>
    %24 = arith.subf %6, %23 : vector<8x128xf32>
    %25 = vector.broadcast %22 : vector<8x1xf32> to vector<8x128xf32>
    %26 = arith.mulf %24, %25 : vector<8x128xf32>
    %27 = vector.extract_strided_slice %3 {offsets = [1, 0], sizes = [1, 128], strides = [1, 1]} : vector<8x128xf32> to vector<1x128xf32>
    %28 = vector.broadcast %27 : vector<1x128xf32> to vector<8x128xf32>
    %29 = arith.mulf %26, %28 : vector<8x128xf32>
    %30 = vector.extract_strided_slice %3 {offsets = [2, 0], sizes = [1, 128], strides = [1, 1]} : vector<8x128xf32> to vector<1x128xf32>
    %31 = vector.broadcast %30 : vector<1x128xf32> to vector<8x128xf32>
    %32 = arith.addf %29, %31 : vector<8x128xf32>
    %33 = arith.truncf %32 : vector<8x128xf32> to vector<8x128xbf16>
    %c0_11 = arith.constant 0 : index
    %c0_12 = arith.constant 0 : index
    %34 = vector.load %arg4[%c0_11, %c0_12] : memref<8x128xbf16, #tpu.memory_space<vmem>>, vector<8x128xbf16>
    tpu.vector_store %arg4[%c0_11, %c0_12], %33 {strides = array<i32>} : memref<8x128xbf16, #tpu.memory_space<vmem>>, vector<8x128xbf16>,
    return
  }
  func.func @transform_0(%arg0: i32) -> (i32, i32) {
    %c0_i32 = arith.constant 0 : i32
    %c0_i32_0 = arith.constant 0 : i32
    return %arg0, %c0_i32 : i32, i32
  }
  func.func @transform_1(%arg0: i32) -> (i32, i32) {
    %c0_i32 = arith.constant 0 : i32
    %c0_i32_0 = arith.constant 0 : i32
    %c0_i32_1 = arith.constant 0 : i32
    return %c0_i32, %c0_i32_0 : i32, i32
  }
  func.func @transform_2(%arg0: i32) -> (i32, i32) {
    %c0_i32 = arith.constant 0 : i32
    %c0_i32_0 = arith.constant 0 : i32
    %c0_i32_1 = arith.constant 0 : i32
    return %c0_i32, %c0_i32_0 : i32, i32
  }
  func.func @transform_3(%arg0: i32) -> (i32, i32) {
    %c0_i32 = arith.constant 0 : i32
    %c0_i32_0 = arith.constant 0 : i32
    return %arg0, %c0_i32 : i32, i32
  }
}

</mosaic_0001>

<bundles_post_ra>
// kernel: _forward_impl.1
= control target key start
LH: loop header
LB: loop body
LE: loop exit
PB: predicated region body
PF: predicated region fallthrough
CT: control target
= control target key end

     0   :  { %v265_v1 = vmov 0   ;;  %vm124_vm0 = vcmask 523264   ;;  %s341_s0 = inlined_call_operand.vmem [shape: bf16[8,192], index: 0, kind: input, shape index: {}]   ;;  %s342_s1 = inlined_call_operand.vmem [shape: bf16[192,128], index: 1, kind: input, shape index: {}]   ;;  %s343_s2 = inlined_call_operand.vmem [shape: f32[8,128], index: 2, kind: input, shape index: {}]   ;;  %s344_s3 = inlined_call_operand.hbm [shape: bf16[8,128], index: 3, kind: output, shape index: {}]  }
   0x1   :  { %v225_v0 = vld [vmem:[%s342_s1] sm:$0xff]   ;;  %128 = vmatprep.subr.bf16.mxu0 %v265_v1  ;;  %v226_v2 = vld [vmem:[%s342_s1 + $0x8] sm:$0xff]   ;;  %v227_v3 = vld [vmem:[%s342_s1 + $0x10] sm:$0xff]  }
   0x2   :  { %129 = vmatpush1.bf16.msra.mxu0 %v225_v0  ;;  %v228_v4 = vld [vmem:[%s342_s1 + $0x18] sm:$0xff]   ;;  %v16_v5 = vld [vmem:[%s341_s0] sm:$0xff] }
   0x3   :  { %130 = vmatprep.subr.bf16.mxu0 %v265_v1 }
   0x6   :  { %131 = vmatpush1.bf16.msra.mxu0 %v226_v2 }
   0x7   :  { %132 = vmatprep.subr.bf16.mxu0 %v265_v1 }
   0xa   :  { %133 = vmatpush1.bf16.msra.mxu0 %v227_v3 }
   0xb   :  { %134 = vmatprep.subr.bf16.mxu0 %v265_v1 }
   0xc   :  { %8 = vsyncpa [#allocation3], 0  ;;  %v209_v6 = vcombine.high %v16_v5, %v16_v5  ;;  %v229_v7 = vld [vmem:[%s342_s1 + $0x20] sm:$0xff]   ;;  %v230_v8 = vld [vmem:[%s342_s1 + $0x28] sm:$0xff]   ;;  %v208_v15 = vcombine.low %v16_v5, %v16_v5  ;;  %v42_v16 = vlaneseq }
   0xd   :  { %v231_v9 = vld [vmem:[%s342_s1 + $0x30] sm:$0xff]   ;;  %v232_v10 = vld [vmem:[%s342_s1 + $0x38] sm:$0xff]   ;;  %v233_v11 = vld [vmem:[%s342_s1 + $0x40] sm:$0xff]  }
   0xe   :  { %135 = vmatpush1.bf16.msra.mxu0 %v228_v4  ;;  %222 = vmatprep.mubr.msk.bf16.mxu0 %vm124_vm0, %v209_v6  ;;  %v234_v12 = vld [vmem:[%s342_s1 + $0x48] sm:$0xff]   ;;  %v235_v13 = vld [vmem:[%s342_s1 + $0x50] sm:$0xff]   ;;  %v236_v14 = vld [vmem:[%s342_s1 + $0x58] sm:$0xff]   ;;  %v43_v17 = vshrl.u32 %v42_v16, 7  ;;  %s266_s1 = smov [#allocation2]  }
   0xf   :  { %136 = vmatprep.subr.bf16.mxu0 %v265_v1  ;;  %v41_v19 = vld [vmem:[%s343_s2] sm:$0xff]  ;;  %s200_s2 = sshll.u32 %s266_s1, 4  ;;  %s201_s2 = int_to_ptr.vmem [resolvable:$true] %s200_s2 }
  0x10   :  { %v44_v18 = vsub.s32 0, %v43_v17  ;;  %v184_v35 = vsub.s32 1, %v43_v17  ;;  %v189_v36 = vsub.s32 2, %v43_v17  ;;  %s241_s12 = scalar_lea.vmem %s201_s2, 64  ;;  %p246_p1 = scmp.lt.s32.totalorder %s201_s2, %s201_s2 }
  0x11   :  { %p242_p0 = scmp.ne.s32.totalorder %s201_s2, %s241_s12  ;;  %p247_p2 = scmp.lt.s32.totalorder %s241_s12, %s241_s12 }
  0x12   :  { %137 = vmatpush1.bf16.msra.mxu0 %v229_v7  ;;  %v45_v20 = vrot.slane %v41_v19, %v44_v18  ;;  %v185_v38 = vrot.slane %v41_v19, %v184_v35  ;;  %v190_v41 = vrot.slane %v41_v19, %v189_v36 }
  0x13   :  { %138 = vmatprep.subr.bf16.mxu0 %v265_v1  ;;  %p248_p3 = por %p247_p2, %p246_p1 }
  0x15   :  { %p249_p4 = pnand %p248_p3, %p242_p0 }
  0x16   :  { %139 = vmatpush1.bf16.msra.mxu0 %v230_v8 }
  0x17   :  { %140 = vmatprep.subr.bf16.mxu0 %v265_v1 }
  0x1a   :  { %141 = vmatpush1.bf16.msra.mxu0 %v231_v9 }
  0x1b   :  { %142 = vmatprep.subr.bf16.mxu0 %v265_v1 }
  0x1e   :  { %143 = vmatpush1.bf16.msra.mxu0 %v232_v10 }
  0x1f   :  { %144 = vmatprep.subr.bf16.mxu0 %v265_v1 }
  0x22   :  { %145 = vmatpush1.bf16.msra.mxu0 %v233_v11 }
  0x23   :  { %146 = vmatprep.subr.bf16.mxu0 %v265_v1 }
  0x26   :  { %147 = vmatpush1.bf16.msra.mxu0 %v234_v12 }
  0x27   :  { %148 = vmatprep.subr.bf16.mxu0 %v265_v1 }
  0x2a   :  { %149 = vmatpush1.bf16.msra.mxu0 %v235_v13 }
  0x2b   :  { %150 = vmatprep.subr.bf16.mxu0 %v265_v1 }
  0x2e   :  { %151 = vmatpush1.bf16.msra.mxu0 %v236_v14 }
  0x31   :  { %161 = vmatmul.mubr.bf16.vlgmr.msra.gmra.mrb[0].mxu0 %v208_v15 }
 0x104   :  { %v162_v21 = vpop.f32.mrb[0].mxu0 }
 0x105   :  { %v163_v22 = vadd.f32 %v162_v21, %v45_v20  ;;  %v164_v23 = vpop.f32.mrb[1].mxu0 }
 0x106   :  { %v165_v24 = vpop.f32.mrb[2].mxu0 }
 0x107   :  { %v166_v25 = vpop.f32.mrb[3].mxu0  ;;  %168 = vadd.xlane.f32.xlu0 %v163_v22  ;;  %v171_v26 = vmul.f32 %v163_v22, %v163_v22 }
 0x10b   :  { %172 = vadd.xlane.f32.xlu0 %v171_v26 }
 0x194   :  { %v169_v27 = vpop.xlane.xlu0 %168 }
 0x195   :  { %v170_v28 = vmul.f32 0.03125, %v169_v27 }
 0x197   :  { %v175_v30 = vmul.f32 %v170_v28, %v170_v28  ;;  %v180_v37 = vsub.f32 %v163_v22, %v170_v28 }
 0x198   :  { %v173_v29 = vpop.xlane.xlu0 %172 }
 0x199   :  { %v174_v31 = vmul.f32 0.03125, %v173_v29 }
 0x19b   :  { %v176_v32 = vsub.f32 %v174_v31, %v175_v30 }
 0x19d   :  { %v177_v33 = vmax.f32 %v176_v32, 0.0 }
 0x19f   :  { %v178_v34 = vadd.f32 1e-05, %v177_v33 }
 0x1a1   :  { %239 = vrsqrt.f32 %v178_v34 }
 0x1ab   :  { %v240_v39 = vpop.eup %239 }
 0x1ac   :  { %v181_v40 = vmul.f32 %v240_v39, %v180_v37 }
 0x1ae   :  { %v186_v42 = vmul.f32 %v185_v38, %v181_v40 }
 0x1b0   :  { %v191_v43 = vadd.f32 %v190_v41, %v186_v42 }
 0x1b2   :  { %v192_v44 = vpack.c.bf16 %v191_v43, %v191_v43 }
 0x1b4   :  { %193 = vst [vmem:[#allocation2] sm:$0xf] %v192_v44 }
 0x1b5   :  { %252 = shalt.err (!%p249_p4)
}
 0x1b6   :  { %s253_s15 = scalar_lea.hbm %s344_s3, 64 }
 0x1b7   :  { %p254_p5 = scmp.ne.s32.totalorder %s344_s3, %s253_s15  ;;  %p257_p6 = scmp.lt.u32.totalorder %s253_s15, %s344_s3 }
 0x1b9   :  { %p259_p7 = pnand %p257_p6, %p254_p5 }
 0x1bb   :  { %262 = shalt.err (!%p259_p7)
}
 0x1bc   :  { %203 = dma.vmem_to_hbm [thread:$0]  %s201_s2, 64, %s344_s3, [#allocation3]  }
 0x1bd   :  { %263 = dma.done.wait [#allocation3], 64  }
 0x1be   :  { %264 = vsyncadd [#allocation3], 4294967232 }
 0x1bf   :  { %207 = vsyncpa [#allocation3], 1 }

</bundles_post_ra>
